<compile_context>
chip_gen: v5e
topology: v5e:2x2
jax: 0.10.0
libtpu: 0.0.40
codegen_flags: <defaults>
</compile_context>

<pallas_src>
import math

import jax
import jax.numpy as jnp
from jax.experimental import pallas as pl
from jax.experimental.pallas import tpu as pltpu

_LANE = 128           # TPU vreg lane width
_GRAIN = 8 * _LANE    # batch-tile granularity: full (8, 128) vreg tiles


def _linear_kernel(x_ref, w_ref, b_ref, o_ref):
    # x_ref: [bm, IN]   natural-layout activations (batch on sublanes)
    # w_ref: [OUT, IN]  PyTorch-layout weight (OUT == 1), VMEM-resident
    # b_ref: [OUT]      bias scalar in SMEM
    # o_ref: [bm, OUT]  output block
    x = x_ref[...]                                            # [bm, IN]
    w = w_ref[...]                                            # [1, IN] -> sublane-broadcast
    # VPU multiply + lane reduction: no MXU fill/drain, no pad-to-tile.
    y = jnp.sum(x * w, axis=1, keepdims=True) + b_ref[0]      # [bm, 1]
    o_ref[...] = y.astype(o_ref.dtype)


def _vmem_capacity_bytes() -> int:
    """Physical VMEM of the current chip (conservative fallback: v7x, 64 MiB)."""
    try:
        cap = getattr(pltpu.get_tpu_info(), "vmem_capacity_bytes", None)
    except Exception:
        cap = None
    return int(cap) if cap else (64 << 20)


def _pick_bm(B: int, vmem_budget_bytes: int, min_tiles: int = 4) -> int:
    """Batch-tile size: as big as the VMEM budget allows, but split into
    >= min_tiles grid steps at large B so both v7x TensorCores get work
    (harmless on single-TensorCore v5e/v6e)."""
    # Double-buffered per-row VMEM footprint of the pipeline:
    #   x tile (bm, IN): lane-pads IN -> 128  -> 512 B/row
    #   y tile (bm, 1):  lane-pads  1 -> 128  -> 512 B/row
    bytes_per_row = 2 * (2 * _LANE * 4)
    bm_vmem = max(_GRAIN, (vmem_budget_bytes // bytes_per_row) // _GRAIN * _GRAIN)
    bm_split = pl.cdiv(pl.cdiv(B, min_tiles), _GRAIN) * _GRAIN
    bm = min(bm_vmem, bm_split)
    if B <= bm:
        return B        # single full-batch tile (full dim is always a legal block)
    return bm           # multiple of 8*128 -> layout-aligned tiles


def linear_forward(x, weight, bias, *, min_pallas_batch=4096, bm=None):
    """Forward of nn.Linear: x @ weight.T + bias.

    x:      [B, IN]   float32 (natural PyTorch layout; no transpose / no pad)
    weight: [OUT, IN] float32 (PyTorch layout)
    bias:   [OUT]     float32
    returns [B, OUT]  float32
    """
    B, IN = x.shape
    OUT = weight.shape[0]

    # Small-batch fallback: XLA fuses this trivially; the pallas_call launch
    # and DMA setup would dwarf the tiny amount of real work.
    if OUT != 1 or B < max(min_pallas_batch, 1):
        return x @ weight.T + bias

    cap = _vmem_capacity_bytes()
    if bm is None:
        bm = _pick_bm(B, cap // 2)
    if bm < B:
        bm = max(8, (bm // 8) * 8)   # tiled blocks need sublane-aligned rows
    # Raise the scoped-VMEM limit explicitly: defaults are 16 MiB (v5e) /
    # 32 MiB (v6e, v7x), below the big-tile footprint used at large B.
    vmem_limit = int(min(cap - (8 << 20), cap // 2 + (16 << 20)))

    return pl.pallas_call(
        _linear_kernel,
        out_shape=jax.ShapeDtypeStruct((B, OUT), x.dtype),
        grid=(pl.cdiv(B, bm),),                    # ragged tail clipped by Pallas
        in_specs=[
            # natural-layout, batch-tiled activations (no wrapper transpose/pad)
            pl.BlockSpec((bm, IN), lambda i: (i, 0)),
            # tiny weight stays VMEM-resident across all batch tiles
            pl.BlockSpec((OUT, IN), lambda i: (0, 0)),
            # bias: one 4-byte scalar -> SMEM (no vector-load slot / DMA wasted)
            pl.BlockSpec(memory_space=pltpu.MemorySpace.SMEM),
        ],
        out_specs=pl.BlockSpec((bm, OUT), lambda i: (i, 0)),
        compiler_params=pltpu.CompilerParams(
            # batch tiles are independent -> both v7x TensorCores split them
            dimension_semantics=("parallel",),
            vmem_limit_bytes=vmem_limit,
        ),
    )(x, weight, bias)


if __name__ == "__main__":
    input_size = 10
    output_size = 1
    batch = 8

    key = jax.random.PRNGKey(0)
    kx, kw, kb, kx2 = jax.random.split(key, 4)

    # nn.Linear default init: uniform in [-1/sqrt(fan_in), 1/sqrt(fan_in)].
    bound = 1.0 / math.sqrt(input_size)
    weight = jax.random.uniform(kw, (output_size, input_size),
                                jnp.float32, -bound, bound)   # PyTorch [OUT, IN]
    bias = jax.random.uniform(kb, (output_size,), jnp.float32, -bound, bound)

    # Small example consistent with the module; force the Pallas kernel path.
    x = jax.random.normal(kx, (batch, input_size), jnp.float32)
    out = jax.block_until_ready(linear_forward(x, weight, bias, min_pallas_batch=0))
    ref = x @ weight.T + bias
    assert out.shape == (batch, output_size)
    assert jnp.allclose(out, ref, atol=1e-5, rtol=1e-5)

    # Multi-tile + ragged-tail path (still small): grid of 4, last tile clipped.
    x2 = jax.random.normal(kx2, (1000, input_size), jnp.float32)
    out2 = jax.block_until_ready(
        linear_forward(x2, weight, bias, min_pallas_batch=0, bm=256))
    ref2 = x2 @ weight.T + bias
    assert out2.shape == (1000, output_size)
    assert jnp.allclose(out2, ref2, atol=1e-5, rtol=1e-5)

    print("KERNEL_OK")
</pallas_src>

<mosaic_0001>
module attributes {stable_mosaic.version = 11 : i64} {
  func.func @_linear_kernel(%arg0: i32, %arg1: memref<8x10xf32, #tpu.memory_space<vmem>>, %arg2: memref<1x10xf32, #tpu.memory_space<vmem>>, %arg3: memref<1xf32, #tpu.memory_space<smem>>, %arg4: memref<8x1xf32, #tpu.memory_space<vmem>>) attributes {dimension_semantics = [#tpu.dimension_semantics<parallel>], iteration_bounds = array<i64: 1>, scalar_prefetch = 0 : i64, scratch_operands = 0 : i64, tpu.core_type = #tpu.core_type<tc>, window_params = [{transform_indices = @transform_0, window_bounds = array<i64: 8, 10>}, {pipeline_mode = #tpu.pipeline_mode<synchronous>, transform_indices = @transform_1, window_bounds = array<i64: 1, 10>}, {transform_indices = @transform_2, window_bounds = array<i64: 1>}, {transform_indices = @transform_3, window_bounds = array<i64: 8, 1>}]} {
    %c0 = arith.constant 0 : index
    %c0_0 = arith.constant 0 : index
    %0 = vector.load %arg1[%c0, %c0_0] : memref<8x10xf32, #tpu.memory_space<vmem>>, vector<8x10xf32>
    %c0_1 = arith.constant 0 : index
    %c0_2 = arith.constant 0 : index
    %1 = vector.load %arg2[%c0_1, %c0_2] : memref<1x10xf32, #tpu.memory_space<vmem>>, vector<1x10xf32>
    %2 = vector.broadcast %1 : vector<1x10xf32> to vector<8x10xf32>
    %3 = arith.mulf %0, %2 : vector<8x10xf32>
    %cst = arith.constant dense<0.000000e+00> : vector<8xf32>
    %4 = vector.multi_reduction <add>, %3, %cst [1] : vector<8x10xf32> to vector<8xf32>
    %5 = vector.shape_cast %4 : vector<8xf32> to vector<8x1xf32>
    %c0_3 = arith.constant 0 : index
    %6 = memref.load %arg3[%c0_3] : memref<1xf32, #tpu.memory_space<smem>>
    %7 = vector.broadcast %6 : f32 to vector<8x1xf32>
    %8 = arith.addf %5, %7 : vector<8x1xf32>
    %c0_4 = arith.constant 0 : index
    %c0_5 = arith.constant 0 : index
    %9 = vector.load %arg4[%c0_4, %c0_5] : memref<8x1xf32, #tpu.memory_space<vmem>>, vector<8x1xf32>
    tpu.vector_store %arg4[%c0_4, %c0_5], %8 {strides = array<i32>} : memref<8x1xf32, #tpu.memory_space<vmem>>, vector<8x1xf32>,
    return
  }
  func.func @transform_0(%arg0: i32) -> (i32, i32) {
    %c0_i32 = arith.constant 0 : i32
    %c0_i32_0 = arith.constant 0 : i32
    return %arg0, %c0_i32 : i32, i32
  }
  func.func @transform_1(%arg0: i32) -> (i32, i32) {
    %c0_i32 = arith.constant 0 : i32
    %c0_i32_0 = arith.constant 0 : i32
    %c0_i32_1 = arith.constant 0 : i32
    return %c0_i32, %c0_i32_0 : i32, i32
  }
  func.func @transform_2(%arg0: i32) -> i32 {
    %c0_i32 = arith.constant 0 : i32
    %c0_i32_0 = arith.constant 0 : i32
    return %c0_i32 : i32
  }
  func.func @transform_3(%arg0: i32) -> (i32, i32) {
    %c0_i32 = arith.constant 0 : i32
    %c0_i32_0 = arith.constant 0 : i32
    return %arg0, %c0_i32 : i32, i32
  }
}

</mosaic_0001>

<bundles_post_ra>
// kernel: tpu_custom_call.1
= control target key start
LH: loop header
LB: loop body
LE: loop exit
PB: predicated region body
PF: predicated region fallthrough
CT: control target
= control target key end

     0   :  { %9 = vsyncpa [#allocation4], 0  ;;  %s77_s15 = smov [#allocation3]   ;;  %s110_s0 = inlined_call_operand.hbm [shape: f32[8,10], index: 0, kind: input, shape index: {}]   ;;  %s111_s1 = inlined_call_operand.vmem [shape: f32[1,10], index: 1, kind: input, shape index: {}]   ;;  %s112_s2 = inlined_call_operand.<no memory space> [shape: f32[1], index: 2, kind: input, shape index: {}]   ;;  %s113_s3 = inlined_call_operand.vmem [shape: f32[8,1], index: 3, kind: output, shape index: {}]  }
   0x1   :  { %s15_s14 = sshll.u32 %s110_s0, 4  ;;  %s17_s16 = sshll.u32 %s77_s15, 4  ;;  %s16_s14 = int_to_ptr.hbm [resolvable:$true] %s15_s14  ;;  %s18_s16 = int_to_ptr.vmem [resolvable:$true] %s17_s16 }
   0x2   :  { %20 = dma.hbm_to_vmem [thread:$0]  %s16_s14, 128, %s18_s16, [#allocation4]  }
   0x3   :  { %75 = dma.done.wait [#allocation4], 128  }
   0x4   :  { %76 = vsyncadd [#allocation4], 4294967168  ;;  %v29_v0 = vld [vmem:[#allocation3] sm:$0xff]  ;;  %vm35_vm0 = vcmask 80896   ;;  %v40_v4 = vstv %s112_s2  ;;  %vm42_vm1 = vcmask 7168  }
   0x5   :  { %v50_v1 = vld [vmem:[%s111_s1] ss:$0 sm:$0xff] }
   0x6   :  { %v34_v2 = vmul.f32 %v50_v1, %v29_v0 }
   0x8   :  { %v36_v3 = vsel %vm35_vm0, %v34_v2, 0.0 }
   0x9   :  { %37 = vadd.xlane.f32.xlu0 %v36_v3 }
  0x7c   :  { %v38_v5 = vpop.xlane.xlu0 %37 }
  0x7d   :  { %v41_v6 = vadd.f32 %v40_v4, %v38_v5 }
  0x7f   :  { %43 = vst.msk [vmem:[%s113_s3] sm:$0xff] %vm42_vm1, %v41_v6 }
  0x80   :  { %48 = vsyncpa [#allocation4], 1 }

</bundles_post_ra>
